<compile_context>
chip_gen: v5e
topology: v5e:2x2
jax: 0.10.0
libtpu: 0.0.40
codegen_flags: <defaults>
</compile_context>

<pallas_src>
import functools

import jax
import jax.numpy as jnp
from jax import lax
from jax.experimental import pallas as pl
from jax.experimental.pallas import tpu as pltpu


# ----------------------------- hardware-derived limits -----------------------------
def _tpu_vmem_capacity_bytes():
    try:
        info = pltpu.get_tpu_info()
        for attr in ("vmem_capacity_bytes", "vmem_bytes", "vmem_size_bytes"):
            v = getattr(info, attr, None)
            if v:
                return int(v)
    except Exception:
        pass
    return 64 * 1024 * 1024          # conservative (v7x-sized) fallback


_VMEM_CAP = _tpu_vmem_capacity_bytes()
# Leave headroom for Mosaic internal scratch / double buffering: 48 MiB on 64-MiB
# parts (v7x), 96 MiB on 128-MiB parts (v5e/v6e).
_VMEM_LIMIT = min((_VMEM_CAP * 3) // 4, 96 * 1024 * 1024)
_VMEM_BUDGET = int(_VMEM_LIMIT * 0.7)


# --------------------- lane-dense (minor-dim merge) capability probe ---------------------
@functools.lru_cache(maxsize=None)
def _can_flatten_minor(c):
    """True if an in-kernel reshape (rows, cols, c) -> (rows, cols*c) lowers in Mosaic."""
    if c % 128 == 0:
        return False                 # already lane-dense; flattening is a no-op

    def _probe_kernel(x_ref, o_ref):
        o_ref[...] = x_ref[...].reshape(16, 8 * c)

    try:
        fn = pl.pallas_call(
            _probe_kernel,
            out_shape=jax.ShapeDtypeStruct((16, 8 * c), jnp.float32))
        jax.block_until_ready(fn(jnp.zeros((16, 8, c), jnp.float32)))
        return True
    except Exception:
        return False


# ----------------------- target_feat pre-projection kernel -----------------------
def _tf_precompute_kernel(tf_ref, w_z_ref, b_z_ref, w_m_ref, b_m_ref,
                          pair_bias_ref, tfm_ref):
    tf = tf_ref[0]                                                   # [N, tf_dim]
    # pair_bias = tf @ (W_zi + W_zj) + (b_zi + b_zj + b_relpos)   (weights pre-folded)
    pair_bias_ref[0] = (jnp.dot(tf, w_z_ref[...], preferred_element_type=jnp.float32)
                        + b_z_ref[...]).astype(pair_bias_ref.dtype)
    tfm_ref[0] = (jnp.dot(tf, w_m_ref[...], preferred_element_type=jnp.float32)
                  + b_m_ref[...]).astype(tfm_ref.dtype)


def tf_precompute(target_feat, w_zsum, b_zsum, w_tfm, b_tfm):
    B, N, tf_dim = target_feat.shape
    c_z = w_zsum.shape[1]
    c_m = w_tfm.shape[1]
    return pl.pallas_call(
        _tf_precompute_kernel,
        out_shape=(jax.ShapeDtypeStruct((B, N, c_z), jnp.float32),
                   jax.ShapeDtypeStruct((B, N, c_m), jnp.float32)),
        grid=(B,),
        in_specs=[
            pl.BlockSpec((1, N, tf_dim), lambda b: (b, 0, 0)),
            pl.BlockSpec((tf_dim, c_z), lambda b: (0, 0)),
            pl.BlockSpec((1, c_z), lambda b: (0, 0)),
            pl.BlockSpec((tf_dim, c_m), lambda b: (0, 0)),
            pl.BlockSpec((1, c_m), lambda b: (0, 0)),
        ],
        out_specs=(pl.BlockSpec((1, N, c_z), lambda b: (b, 0, 0)),
                   pl.BlockSpec((1, N, c_m), lambda b: (b, 0, 0))),
        compiler_params=pltpu.CompilerParams(
            dimension_semantics=("parallel",)),
    )(target_feat, w_zsum, b_zsum, w_tfm, b_tfm)


# ----------------------------- MSA embedding kernel -----------------------------
def _msa_kernel(msa_ref, tfm_ref, w_msa_ref, b_msa_ref, out_ref, *, lane_dense):
    ts, n, msa_dim = msa_ref.shape[1], msa_ref.shape[2], msa_ref.shape[3]
    c_m = w_msa_ref.shape[1]
    msa = msa_ref[0].reshape(ts * n, msa_dim)                        # merge leading dims
    l1 = jnp.dot(msa, w_msa_ref[...], preferred_element_type=jnp.float32) + b_msa_ref[...]
    out = l1.reshape(ts, n, c_m) + tfm_ref[0][None, :, :]            # broadcast over clusters
    if lane_dense:
        out_ref[0] = out.reshape(ts, n * c_m).astype(out_ref.dtype)  # dense 128-lane stores
    else:
        out_ref[0] = out.astype(out_ref.dtype)


def _choose_ts(B, S, N, msa_dim, c_m, target_rows):
    # rows of S (clusters) per grid step: target residue-rows, bounded by VMEM budget
    per_cluster_bytes = N * (msa_dim + c_m) * 4 * 2     # in + out blocks, double buffered
    ts_cap = max(1, _VMEM_BUDGET // max(per_cluster_bytes, 1))
    ts = max(1, target_rows // max(N, 1))
    ts = min(ts, ts_cap)
    if B == 1:
        # v7x megacore occupancy: at least 2 grid steps along S when possible.
        ts = min(ts, max(1, -(-S // 2)))
    if ts >= S:
        return S
    # flattened-output block needs its sublane dim to be a multiple of 8 (or == S)
    return max(8, (ts // 8) * 8)


def msa_embedding(msa_feat, tf_m_emb, w_msa, b_msa, *, target_rows=None,
                  out_dtype=jnp.float32):
    B, S, N, msa_dim = msa_feat.shape
    c_m = w_msa.shape[1]
    lane_dense = (c_m % 128 != 0) and _can_flatten_minor(c_m)
    if target_rows is None:
        target_rows = 4096 if _VMEM_CAP >= 128 * 1024 * 1024 else 2048
    ts = _choose_ts(B, S, N, msa_dim, c_m, target_rows)

    kernel = functools.partial(_msa_kernel, lane_dense=lane_dense)
    if lane_dense:
        out_shape = jax.ShapeDtypeStruct((B, S, N * c_m), out_dtype)
        out_spec = pl.BlockSpec((1, ts, N * c_m), lambda b, s: (b, s, 0))
    else:
        out_shape = jax.ShapeDtypeStruct((B, S, N, c_m), out_dtype)
        out_spec = pl.BlockSpec((1, ts, N, c_m), lambda b, s: (b, s, 0, 0))

    out = pl.pallas_call(
        kernel,
        out_shape=out_shape,
        grid=(B, pl.cdiv(S, ts)),
        in_specs=[
            pl.BlockSpec((1, ts, N, msa_dim), lambda b, s: (b, s, 0, 0)),
            pl.BlockSpec((1, N, c_m), lambda b, s: (b, 0, 0)),   # tf projection: read, not recomputed
            pl.BlockSpec((msa_dim, c_m), lambda b, s: (0, 0)),
            pl.BlockSpec((1, c_m), lambda b, s: (0, 0)),
        ],
        out_specs=out_spec,
        compiler_params=pltpu.CompilerParams(
            dimension_semantics=("parallel", "parallel"),
            vmem_limit_bytes=_VMEM_LIMIT),
    )(msa_feat, tf_m_emb, w_msa, b_msa)

    if lane_dense:
        out = out.reshape(B, S, N, c_m)                 # free split of the last dim
    return out


# ----------------------------- Pair embedding kernel -----------------------------
def _pair_kernel(ri_i_ref, ri_j_ref, bias_ref, w_rel_ref, out_ref, *, relpos_k, lane_dense):
    ti = ri_i_ref.shape[1]
    tj = ri_j_ref.shape[2]
    num_bins, c_z = w_rel_ref.shape

    # Integer relative distance for this (i-tile, j-tile): no float cast, no transpose.
    ri_i = ri_i_ref[0]                                               # [TI, 1] int32
    ri_j = ri_j_ref[0]                                               # [1, TJ] int32
    rd = ri_i - ri_j                                                 # [TI, TJ] int32
    # Nearest consecutive-integer bin == clamp (exact vs. torch argmin for int inputs).
    idx = jnp.clip(rd + relpos_k, 0, num_bins - 1)                   # [TI, TJ] int32

    # relpos[i,j,:] = w_rel[idx[i,j], :] via one-hot x table matmul (MXU; hidden under
    # the output DMA).  General row-gather has no Mosaic lowering.
    lane = lax.broadcasted_iota(jnp.int32, (ti, tj, num_bins), 2)
    one_hot = (lane == idx[:, :, None]).astype(jnp.float32)          # [TI, TJ, nb]
    relpos = jnp.dot(one_hot.reshape(ti * tj, num_bins), w_rel_ref[...],
                     preferred_element_type=jnp.float32)

    # bias_ref already holds tf@W_zi + b_zi + tf@W_zj + b_zj + b_relpos, indexed by j
    # (the reference broadcasts BOTH emb_i and emb_j over the first residue axis).
    pair = relpos.reshape(ti, tj, c_z) + bias_ref[0][None, :, :]
    if lane_dense:
        out_ref[0] = pair.reshape(ti, tj * c_z).astype(out_ref.dtype)   # dense stores
    else:
        out_ref[0] = pair.astype(out_ref.dtype)


def _pick_pair_tj(c_z, num_bins, ti=128):
    # Grow the j-tile only when the double-buffered output block plus the one-hot /
    # relpos temporaries comfortably fit the scoped-VMEM budget (true on 128-MiB
    # parts or for small c_z); otherwise keep 128 (safe on v7x's 64-MiB VMEM).
    for tj in (256, 128):
        est = (ti * tj * c_z * 4) * 2            # output block, double buffered
        est += (ti * tj * num_bins * 4) * 2      # one-hot value (+ reshape copy)
        est += (ti * tj * c_z * 4) * 2           # relpos (+ reshape copy)
        est += (tj * c_z * 4) * 2                # bias block, double buffered
        if est <= _VMEM_BUDGET:
            return tj
    return 128


def pair_embedding(residue_index, pair_bias, w_rel, relpos_k, *, ti=128, tj=None,
                   out_dtype=jnp.float32):
    B, N = residue_index.shape
    num_bins, c_z = w_rel.shape
    lane_dense = (c_z % 128 != 0) and _can_flatten_minor(c_z)

    if tj is None:
        tj = _pick_pair_tj(c_z, num_bins, ti=ti)
    ti = min(ti, N)
    tj = min(tj, N)

    ri = residue_index.astype(jnp.int32)
    ri_row = ri.reshape(B, N, 1)   # row-tile view (indexed by i)
    ri_col = ri.reshape(B, 1, N)   # col-tile view (indexed by j)

    kernel = functools.partial(_pair_kernel, relpos_k=relpos_k, lane_dense=lane_dense)

    if lane_dense:
        out_shape = jax.ShapeDtypeStruct((B, N, N * c_z), out_dtype)
        out_spec = pl.BlockSpec((1, ti, tj * c_z), lambda b, i, j: (b, i, j))
    else:
        out_shape = jax.ShapeDtypeStruct((B, N, N, c_z), out_dtype)
        out_spec = pl.BlockSpec((1, ti, tj, c_z), lambda b, i, j: (b, i, j, 0))

    out = pl.pallas_call(
        kernel,
        out_shape=out_shape,
        grid=(B, pl.cdiv(N, ti), pl.cdiv(N, tj)),
        in_specs=[
            pl.BlockSpec((1, ti, 1), lambda b, i, j: (b, i, 0)),
            pl.BlockSpec((1, 1, tj), lambda b, i, j: (b, 0, j)),
            pl.BlockSpec((1, tj, c_z), lambda b, i, j: (b, j, 0)),
            pl.BlockSpec((num_bins, c_z), lambda b, i, j: (0, 0)),
        ],
        out_specs=out_spec,
        compiler_params=pltpu.CompilerParams(
            dimension_semantics=("parallel", "parallel", "parallel"),
            vmem_limit_bytes=_VMEM_LIMIT),
    )(ri_row, ri_col, pair_bias, w_rel)

    if lane_dense:
        out = out.reshape(B, N, N, c_z)                 # free split of the last dim
    return out


# ----------------------------- Module wrapper -----------------------------
class InputEmbedderPallas:
    def __init__(self, tf_dim, msa_dim, c_z, c_m, max_relative_index, key):
        self.relpos_k = max_relative_index
        self.num_bins = 2 * max_relative_index + 1
        ks = jax.random.split(key, 10)

        def lin(kw, kb, fan_in, fan_out):
            w = jax.random.normal(kw, (fan_in, fan_out), jnp.float32) / jnp.sqrt(fan_in)
            b = 0.01 * jax.random.normal(kb, (1, fan_out), jnp.float32)
            return w, b  # stored as [in, out] (already transposed vs. torch)

        self.w_zi, self.b_zi = lin(ks[0], ks[1], tf_dim, c_z)
        self.w_zj, self.b_zj = lin(ks[2], ks[3], tf_dim, c_z)
        self.w_tfm, self.b_tfm = lin(ks[4], ks[5], tf_dim, c_m)
        self.w_msa, self.b_msa = lin(ks[6], ks[7], msa_dim, c_m)
        self.w_rel, self.b_rel = lin(ks[8], ks[9], self.num_bins, c_z)

        # Host-side fold: emb_i and emb_j broadcast identically (both unsqueeze(-3)
        # in the reference), so a single projection suffices; fold b_rel in too.
        self.w_zsum = self.w_zi + self.w_zj
        self.b_zsum = self.b_zi + self.b_zj + self.b_rel

    def __call__(self, target_feat, residue_index, msa_feat, *, out_dtype=jnp.float32):
        # Hoisted once-per-batch projections of target_feat (tiny matmuls).
        pair_bias, tf_m_emb = tf_precompute(
            target_feat, self.w_zsum, self.b_zsum, self.w_tfm, self.b_tfm)
        pair_emb = pair_embedding(residue_index, pair_bias, self.w_rel, self.relpos_k,
                                  out_dtype=out_dtype)
        msa_emb = msa_embedding(msa_feat, tf_m_emb, self.w_msa, self.b_msa,
                                out_dtype=out_dtype)
        return msa_emb, pair_emb


# ----------------------------- Pure-JAX reference -----------------------------
def ref_forward(m, target_feat, residue_index, msa_feat):
    # msa embedding
    l1 = msa_feat @ m.w_msa + m.b_msa[0]
    l2 = target_feat @ m.w_tfm + m.b_tfm[0]
    msa_emb = l1 + l2[:, None]
    # pair embedding (argmin over bins, like the torch spec)
    emb_i = target_feat @ m.w_zi + m.b_zi[0]
    emb_j = target_feat @ m.w_zj + m.b_zj[0]
    ri = residue_index.astype(jnp.float32)
    bins = jnp.arange(-m.relpos_k, m.relpos_k + 1, dtype=jnp.float32)
    rd = ri[:, :, None] - ri[:, None, :]
    idx = jnp.argmin(jnp.abs(rd[..., None] - bins), axis=-1)
    oh = jax.nn.one_hot(idx, m.num_bins, dtype=jnp.float32)
    relpos = oh @ m.w_rel + m.b_rel[0]
    pair_emb = relpos + emb_i[:, None, :, :] + emb_j[:, None, :, :]
    return msa_emb, pair_emb


if __name__ == "__main__":
    B, N_res, N_clust = 2, 8, 4
    tf_dim, msa_dim, c_z, c_m, relpos_k = 22, 49, 32, 32, 4

    key = jax.random.PRNGKey(0)
    k_tf, k_msa, k_params = jax.random.split(key, 3)

    target_feat = jax.random.normal(k_tf, (B, N_res, tf_dim), jnp.float32)
    msa_feat = jax.random.normal(k_msa, (B, N_clust, N_res, msa_dim), jnp.float32)
    residue_index = jnp.tile(jnp.arange(N_res, dtype=jnp.int32), (B, 1))

    model = InputEmbedderPallas(tf_dim, msa_dim, c_z, c_m, relpos_k, k_params)

    msa_emb, pair_emb = model(target_feat, residue_index, msa_feat)
    jax.block_until_ready((msa_emb, pair_emb))

    msa_ref, pair_ref = ref_forward(model, target_feat, residue_index, msa_feat)
    assert msa_emb.shape == (B, N_clust, N_res, c_m)
    assert pair_emb.shape == (B, N_res, N_res, c_z)
    assert jnp.allclose(msa_emb, msa_ref, atol=1e-4, rtol=1e-4)
    assert jnp.allclose(pair_emb, pair_ref, atol=1e-4, rtol=1e-4)

    print("KERNEL_OK")
</pallas_src>

<mosaic_0001>
module attributes {stable_mosaic.version = 11 : i64} {
  func.func @_tf_precompute_kernel(%arg0: i32, %arg1: memref<1x8x22xf32, #tpu.memory_space<vmem>>, %arg2: memref<22x32xf32, #tpu.memory_space<vmem>>, %arg3: memref<1x32xf32, #tpu.memory_space<vmem>>, %arg4: memref<22x32xf32, #tpu.memory_space<vmem>>, %arg5: memref<1x32xf32, #tpu.memory_space<vmem>>, %arg6: memref<1x8x32xf32, #tpu.memory_space<vmem>>, %arg7: memref<1x8x32xf32, #tpu.memory_space<vmem>>) attributes {dimension_semantics = [#tpu.dimension_semantics<parallel>], iteration_bounds = array<i64: 2>, scalar_prefetch = 0 : i64, scratch_operands = 0 : i64, tpu.core_type = #tpu.core_type<tc>, window_params = [{transform_indices = @transform_0, window_bounds = array<i64: 1, 8, 22>}, {pipeline_mode = #tpu.pipeline_mode<synchronous>, transform_indices = @transform_1, window_bounds = array<i64: 22, 32>}, {pipeline_mode = #tpu.pipeline_mode<synchronous>, transform_indices = @transform_2, window_bounds = array<i64: 1, 32>}, {pipeline_mode = #tpu.pipeline_mode<synchronous>, transform_indices = @transform_3, window_bounds = array<i64: 22, 32>}, {pipeline_mode = #tpu.pipeline_mode<synchronous>, transform_indices = @transform_4, window_bounds = array<i64: 1, 32>}, {transform_indices = @transform_5, window_bounds = array<i64: 1, 8, 32>}, {transform_indices = @transform_6, window_bounds = array<i64: 1, 8, 32>}]} {
    %c0 = arith.constant 0 : index
    %c0_0 = arith.constant 0 : index
    %c0_1 = arith.constant 0 : index
    %0 = vector.load %arg1[%c0, %c0_0, %c0_1] : memref<1x8x22xf32, #tpu.memory_space<vmem>>, vector<1x8x22xf32>
    %1 = vector.shape_cast %0 : vector<1x8x22xf32> to vector<8x22xf32>
    %c0_2 = arith.constant 0 : index
    %c0_3 = arith.constant 0 : index
    %2 = vector.load %arg2[%c0_2, %c0_3] : memref<22x32xf32, #tpu.memory_space<vmem>>, vector<22x32xf32>
    %cst = arith.constant dense<0.000000e+00> : vector<8x32xf32>
    %3 = tpu.matmul %1, %2, %cst {dimension_numbers = #tpu.dot_dimension_numbers<[1], [0], [0], [1], [0, 0, 1, 1], [], []>} : vector<8x22xf32>, vector<22x32xf32>, vector<8x32xf32> -> vector<8x32xf32>
    %c0_4 = arith.constant 0 : index
    %c0_5 = arith.constant 0 : index
    %4 = vector.load %arg3[%c0_4, %c0_5] : memref<1x32xf32, #tpu.memory_space<vmem>>, vector<1x32xf32>
    %5 = vector.broadcast %4 : vector<1x32xf32> to vector<8x32xf32>
    %6 = arith.addf %3, %5 : vector<8x32xf32>
    %c0_6 = arith.constant 0 : index
    %c0_7 = arith.constant 0 : index
    %c0_8 = arith.constant 0 : index
    %7 = vector.load %arg6[%c0_6, %c0_7, %c0_8] : memref<1x8x32xf32, #tpu.memory_space<vmem>>, vector<1x8x32xf32>
    %8 = vector.shape_cast %7 : vector<1x8x32xf32> to vector<8x32xf32>
    %9 = vector.shape_cast %6 : vector<8x32xf32> to vector<1x8x32xf32>
    tpu.vector_store %arg6[%c0_6, %c0_7, %c0_8], %9 {strides = array<i32>} : memref<1x8x32xf32, #tpu.memory_space<vmem>>, vector<1x8x32xf32>,
    %c0_9 = arith.constant 0 : index
    %c0_10 = arith.constant 0 : index
    %10 = vector.load %arg4[%c0_9, %c0_10] : memref<22x32xf32, #tpu.memory_space<vmem>>, vector<22x32xf32>
    %cst_11 = arith.constant dense<0.000000e+00> : vector<8x32xf32>
    %11 = tpu.matmul %1, %10, %cst_11 {dimension_numbers = #tpu.dot_dimension_numbers<[1], [0], [0], [1], [0, 0, 1, 1], [], []>} : vector<8x22xf32>, vector<22x32xf32>, vector<8x32xf32> -> vector<8x32xf32>
    %c0_12 = arith.constant 0 : index
    %c0_13 = arith.constant 0 : index
    %12 = vector.load %arg5[%c0_12, %c0_13] : memref<1x32xf32, #tpu.memory_space<vmem>>, vector<1x32xf32>
    %13 = vector.broadcast %12 : vector<1x32xf32> to vector<8x32xf32>
    %14 = arith.addf %11, %13 : vector<8x32xf32>
    %c0_14 = arith.constant 0 : index
    %c0_15 = arith.constant 0 : index
    %c0_16 = arith.constant 0 : index
    %15 = vector.load %arg7[%c0_14, %c0_15, %c0_16] : memref<1x8x32xf32, #tpu.memory_space<vmem>>, vector<1x8x32xf32>
    %16 = vector.shape_cast %15 : vector<1x8x32xf32> to vector<8x32xf32>
    %17 = vector.shape_cast %14 : vector<8x32xf32> to vector<1x8x32xf32>
    tpu.vector_store %arg7[%c0_14, %c0_15, %c0_16], %17 {strides = array<i32>} : memref<1x8x32xf32, #tpu.memory_space<vmem>>, vector<1x8x32xf32>,
    return
  }
  func.func @transform_0(%arg0: i32) -> (i32, i32, i32) {
    %c0_i32 = arith.constant 0 : i32
    %c0_i32_0 = arith.constant 0 : i32
    %c0_i32_1 = arith.constant 0 : i32
    return %arg0, %c0_i32, %c0_i32_0 : i32, i32, i32
  }
  func.func @transform_1(%arg0: i32) -> (i32, i32) {
    %c0_i32 = arith.constant 0 : i32
    %c0_i32_0 = arith.constant 0 : i32
    %c0_i32_1 = arith.constant 0 : i32
    return %c0_i32, %c0_i32_0 : i32, i32
  }
  func.func @transform_2(%arg0: i32) -> (i32, i32) {
    %c0_i32 = arith.constant 0 : i32
    %c0_i32_0 = arith.constant 0 : i32
    %c0_i32_1 = arith.constant 0 : i32
    return %c0_i32, %c0_i32_0 : i32, i32
  }
  func.func @transform_3(%arg0: i32) -> (i32, i32) {
    %c0_i32 = arith.constant 0 : i32
    %c0_i32_0 = arith.constant 0 : i32
    %c0_i32_1 = arith.constant 0 : i32
    return %c0_i32, %c0_i32_0 : i32, i32
  }
  func.func @transform_4(%arg0: i32) -> (i32, i32) {
    %c0_i32 = arith.constant 0 : i32
    %c0_i32_0 = arith.constant 0 : i32
    %c0_i32_1 = arith.constant 0 : i32
    return %c0_i32, %c0_i32_0 : i32, i32
  }
  func.func @transform_5(%arg0: i32) -> (i32, i32, i32) {
    %c0_i32 = arith.constant 0 : i32
    %c0_i32_0 = arith.constant 0 : i32
    %c0_i32_1 = arith.constant 0 : i32
    return %arg0, %c0_i32, %c0_i32_0 : i32, i32, i32
  }
  func.func @transform_6(%arg0: i32) -> (i32, i32, i32) {
    %c0_i32 = arith.constant 0 : i32
    %c0_i32_0 = arith.constant 0 : i32
    %c0_i32_1 = arith.constant 0 : i32
    return %arg0, %c0_i32, %c0_i32_0 : i32, i32, i32
  }
}

</mosaic_0001>

<bundles_post_ra>
// kernel: tpu_custom_call.1
= control target key start
LH: loop header
LB: loop body
LE: loop exit
PB: predicated region body
PF: predicated region fallthrough
CT: control target
= control target key end

     0   :  { %s1055_s0 = inlined_call_operand.hbm [shape: f32[2,8,22], index: 0, kind: input, shape index: {}]   ;;  %s1056_s1 = inlined_call_operand.hbm [shape: f32[22,32], index: 1, kind: input, shape index: {}]   ;;  %s1057_s2 = inlined_call_operand.vmem [shape: f32[1,32], index: 2, kind: input, shape index: {}]   ;;  %s1058_s3 = inlined_call_operand.hbm [shape: f32[22,32], index: 3, kind: input, shape index: {}]   ;;  %s1059_s4 = inlined_call_operand.vmem [shape: f32[1,32], index: 4, kind: input, shape index: {}]   ;;  %s1060_s5 = inlined_call_operand.hbm [shape: f32[2,8,32], index: 5, kind: output, shape index: {0}]   ;;  %s1061_s6 = inlined_call_operand.hbm [shape: f32[2,8,32], index: 6, kind: output, shape index: {1}]  }
   0x1   :  { %1062 = sst [smem:[#allocation15_spill]] %s1056_s1 }
   0x2   :  { %12 = vsyncpa [#allocation3], 0 }
   0x3   :  { %14 = vsyncpa [#allocation3 + $0x1], 0 }
   0x4   :  { %15 = vsyncpa [#allocation6], 0 }
   0x5   :  { %16 = vsyncpa [#allocation4], 0 }
   0x6   :  { %18 = vsyncpa [#allocation4 + $0x1], 0 }
   0x7   :  { %19 = vsyncpa [#allocation10], 0 }
   0x8   :  { %21 = vsyncpa [#allocation10 + $0x1], 0  ;;  %s871_s21 = smov 0   ;;  %s873_s22 = smov 0  }
   0x9   :  { %s875_s23 = smov 0   ;;  %s877_s24 = smov 0  }
   0xa LB: > { %s1063_s1 = sld [smem:[#allocation15_spill]]  ;;  %s895_s28 = sadd.s32 4294967295, %s830_s24   ;;  %s830_s24 = sphi %s877_s24, %s1074_s24   ;;  %s826_s23 = sphi %s875_s23, %s1073_s23   ;;  %s822_s22 = sphi %s873_s22, %s1072_s22   ;;  %s818_s21 = sphi %s871_s21, %s1071_s21  }
   0xb   : > { %p540_p0 = scmp.ge.s32.totalorder %s830_s24, 1  ;;  %p48_p1 = scmp.eq.s32.totalorder %s895_s28, 0 }
   0xc   : > { %p194_p2 = scmp.lt.s32.totalorder %s830_s24, 3  ;;  %s832_s30 = smov [#allocation5]  }
   0xd   : > { %s207_s7 = sshll.u32 %s832_s30, 4  ;;  %s222_s10 = sshll.u32 %s1058_s3, 4  ;;  %s208_s7 = int_to_ptr.vmem [resolvable:$true] %s207_s7  ;;  %s223_s10 = int_to_ptr.hbm [resolvable:$true] %s222_s10 }
   0xe   : > { %p900_p3 = pnand %p540_p0, %p194_p2  ;;  %s833_s11 = smov [#allocation7]  }
   0xf   : > { %s224_s12 = sshll.u32 %s833_s11, 4  ;;  %s834_s13 = smov 128   ;;  %s225_s12 = int_to_ptr.vmem [resolvable:$true] %s224_s12 }
  0x10   : > { %s205_s27 = sshll.u32 %s1063_s1, 4  ;;  %p576_p4 = pneg %p900_p3  ;;  %s206_s27 = int_to_ptr.hbm [resolvable:$true] %s205_s27 }
  0x11   : > { %s835_s14 = smov 8   ;;  %s539_s15 = sadd.s32 4294967294, %s830_s24  }
  0x12   : > { %p577_p6 = pnand %p576_p4, %p48_p1  ;;  %s914_s16 = sadd.s32 1, %s830_s24  }
  0x13   : > { %s31_s17 = ssub.s32 %s830_s24, %s914_s16  ;;  %s34_s18 = sadd.s32 1, %s826_s23 }
  0x14   : > { %579 = dma.hbm_to_vmem [thread:$0]  (!%p577_p6), %s206_s27, 384, %s208_s7, [#allocation6], %s834_s13, %s834_s13, %s835_s14  }
  0x15   : > { %582 = dma.hbm_to_vmem [thread:$0]  (!%p577_p6), %s223_s10, 384, %s225_s12, [#allocation6], %s834_s13, %s834_s13, %s835_s14  }
  0x16   : > { %p32_p7 = scmp.eq.s32.totalorder %s31_s17, 0  ;;  %p41_p8 = scmp.ne.s32.totalorder %s826_s23, %s822_s22 }
  0x17   : > { %p42_p9 = scmp.eq.s32.totalorder %s830_s24, 0  ;;  %p47_p10 = scmp.ne.s32.totalorder %s822_s22, %s818_s21 }
  0x18   : > { %s925_s19 = scalar_select %p32_p7, %s826_s23, %s34_s18  }
  0x19   : > { %p927_p11 = por %p42_p9, %p41_p8  ;;  %p933_p12 = por %p48_p1, %p47_p10 }
  0x1a   : > { %p155_p13 = scmp.eq.s32.totalorder %s895_s28, 1  ;;  %p161_p0 = scmp.eq.s32.totalorder %s539_s15, 1 }
  0x1b   : > { %p596_p2 = scmp.lt.s32.totalorder %s830_s24, 2  ;;  %s241_s26 = sand.u32 1, %s826_s23  }
  0x1c   : > { %p940_p4 = por %p155_p13, %p41_p8  ;;  %p944_p6 = por %p161_p0, %p47_p10 }
  0x1d   : > { %s544_s7 = sshll.u32 %s241_s26, 3  ;;  %s545_s8 = sshll.u32 %s830_s24, 3 }
  0x1e   : > { %s249_s11 = scalar_lea.hbm %s1055_s0, %s545_s8  ;;  %s245_s12 = scalar_lea.vmem [#allocation2], %s544_s7 }
  0x1f   : > { %s253_s13 = sshll.u32 %s245_s12, 4  ;;  %s251_s14 = sshll.u32 %s249_s11, 4  ;;  %s254_s13 = int_to_ptr.vmem [resolvable:$true] %s253_s13  ;;  %s252_s14 = int_to_ptr.hbm [resolvable:$true] %s251_s14 }
  0x20   : > { %p954_p7 = pnand %p596_p2, %p927_p11  ;;  %s242_s17 = scalar_lea.sflag [#allocation3], %s241_s26 }
  0x21   : > { %s698_s18 = sshra.s32 %s252_s14, 4  ;;  %s705_s9 = scalar_lea.hbm %s1055_s0, 16  ;;  %s699_s18 = int_to_ptr.hbm [resolvable:$true] %s698_s18 }
  0x22   : > { %s700_s1 = scalar_lea.hbm %s699_s18, 8  ;;  %p702_p9 = pneg %p954_p7 }
  0x23   : > { %p701_p8 = scmp.ne.s32.totalorder %s699_s18, %s700_s1  ;;  %p706_p11 = scmp.lt.s32.totalorder %s699_s18, %s1055_s0 }
  0x24   : > { %p707_p0 = scmp.lt.s32.totalorder %s705_s9, %s700_s1 }
  0x25   : > { %p703_p10 = pnand %p702_p9, %p701_p8 }
  0x26   : > { %p708_p2 = por %p707_p0, %p706_p11 }
  0x27   : > { %p704_p13 = pneg %p703_p10 }
  0x29   : > { %p709_p5 = pnand %p708_p2, %p704_p13 }
  0x2b   : > { %712 = shalt.err (!%p709_p5)
}
  0x2c   : > { %586 = dma.hbm_to_vmem [thread:$0]  (!%p954_p7), %s252_s14, 128, %s254_s13, %s242_s17  }
  0x2d   : > { %262 = sbr.rel (%p900_p3) target bundleno = 202 (0xca), region = 40  ;;  %s971_s26 = sand.u32 (!%p900_p3), 1, %s822_s22  }
  0x2e   : > { %s974_s11 = sshll.u32 (!%p900_p3), %s971_s26, 3  ;;  %s265_s12 = scalar_lea.sflag (!%p900_p3), [#allocation3], %s971_s26 }
  0x2f   : > { %s268_s1 = scalar_lea.vmem (!%p900_p3), [#allocation2], %s974_s11 }
  0x32   : > { %801 = dma.done.wait (%p933_p12), %s265_s12, 128  }
  0x33   : > { %803 = vsyncadd (%p933_p12), %s265_s12, 4294967168 }
  0x34   : > { %805 = dma.done.wait (%p48_p1), [#allocation6], 768  }
  0x35   : > { %807 = vsyncadd (%p48_p1), [#allocation6], 4294966528  ;;  %vm325_vm0 = vcmask 1045504   ;;  %v316_v0 = vld [vmem:[#allocation5 + $0x10] sm:$0x3f]  ;;  %v315_v2 = vld [vmem:[#allocation5 + $0x8] sm:$0xff] }
  0x36   : > { %v353_v1 = vld [vmem:[#allocation7 + $0x10] sm:$0x3f]  ;;  %552 = vmatpush.msk.msra.mxu0 %vm325_vm0, %v316_v0  ;;  %v352_v3 = vld [vmem:[#allocation7 + $0x8] sm:$0xff]  ;;  %v351_v5 = vld [vmem:[#allocation7] sm:$0xff]  ;;  %vm321_vm1 = vcmask 179200   ;;  %s558_s29 = sshll.u32 %s895_s28, 3 }
  0x37   : > { %554 = vmatpush.msk.msra.mxu1 %vm325_vm0, %v353_v1  ;;  %v314_v4 = vld [vmem:[#allocation5] sm:$0xff]  ;;  %v313_v6 = vld [vmem:[%s268_s1] sm:$0xff]  ;;  %s398_s14 = scalar_lea.hbm %s1060_s5, %s558_s29  ;;  %s412_s18 = scalar_lea.hbm %s1061_s6, %s558_s29  ;;  %vm349_vm2 = vcmask 261120  }
  0x38   : > { %343 = vmatpush.msra.mxu0 %v315_v2  ;;  %v636_v7 = vld [vmem:[%s1057_s2] ss:$0 sm:$0xff]  ;;  %s305_s20 = scalar_lea.vmem [#allocation8], %s974_s11  ;;  %s402_s28 = sshll.u32 %s398_s14, 4  ;;  %s403_s28 = int_to_ptr.hbm [resolvable:$true] %s402_s28 }
  0x39   : > { %375 = vmatpush.msra.mxu1 %v352_v3  ;;  %v637_v8 = vld [vmem:[%s1059_s4] ss:$0 sm:$0xff]  ;;  %s1000_s12 = sshll.u32 %s305_s20, 4  ;;  %s312_s1 = scalar_lea.vmem [#allocation9], %s974_s11  ;;  %s401_s12 = int_to_ptr.vmem [resolvable:$true] %s1000_s12 }
  0x3a   : > { %344 = vmatpush.msra.mxu0 %v314_v4  ;;  %s1003_s25 = sshll.u32 %s312_s1, 4  ;;  %s416_s13 = sshll.u32 %s412_s18, 4  ;;  %s415_s25 = int_to_ptr.vmem [resolvable:$true] %s1003_s25  ;;  %s1007_s13 = int_to_ptr.hbm [resolvable:$true] %s416_s13 }
  0x3b   : > { %376 = vmatpush.msra.mxu1 %v351_v5  ;;  %553 = vmatmul.msk.f32.vlgmr.msra.gmra.mxu0 %vm321_vm1, %v313_v6  ;;  %s383_s29 = scalar_lea.sflag [#allocation4], %s971_s26  ;;  %s742_s14 = sshra.s32 %s403_s28, 4  ;;  %s743_s14 = int_to_ptr.hbm [resolvable:$true] %s742_s14 }
  0x3c   : > { %555 = vmatmul.msk.f32.vlgmr.msra.gmra.mxu1 %vm321_vm1, %v313_v6  ;;  %s744_s11 = scalar_lea.hbm %s743_s14, 8  ;;  %s748_s18 = scalar_lea.hbm %s1060_s5, 16 }
  0x3d   : > { %p745_p1 = scmp.ne.s32.totalorder %s743_s14, %s744_s11  ;;  %p749_p12 = scmp.lt.s32.totalorder %s743_s14, %s1060_s5 }
  0x3e   : > { %p750_p7 = scmp.lt.s32.totalorder %s748_s18, %s744_s11 }
  0x3f   : > { %p746_p3 = pnand %p745_p1, %p940_p4 }
  0x40   : > { %p751_p8 = por %p750_p7, %p749_p12 }
  0x41   : > { %p747_p5 = pneg %p746_p3 }
  0x43   : > { %p752_p9 = pnand %p751_p8, %p747_p5 }
  0xb8   : > { %v346_v9 = vpop.f32.mrf.mxu0 }
  0xb9   : > { %v378_v10 = vpop.f32.mrf.mxu1  ;;  %v347_v11 = vadd.f32 %v636_v7, %v346_v9 }
  0xba   : > { %v379_v12 = vadd.f32 %v637_v8, %v378_v10 }
  0xbb   : > { %350 = vst.msk [vmem:[%s305_s20] sm:$0xff] %vm349_vm2, %v347_v11 }
  0xbc   : > { %755 = shalt.err (!%p752_p9)
}
  0xbd   : > { %572 = dma.vmem_to_hbm [thread:$0]  (%p940_p4), %s401_s12, 128, %s403_s28, %s383_s29   ;;  %381 = vst.msk [vmem:[%s312_s1] sm:$0xff] %vm349_vm2, %v379_v12 }
  0xbe   : > { %s388_s9 = scalar_lea.sflag [#allocation10], %s971_s26  ;;  %s770_s10 = sshra.s32 %s1007_s13, 4  ;;  %s771_s10 = int_to_ptr.hbm [resolvable:$true] %s770_s10 }
  0xbf   : > { %s772_s20 = scalar_lea.hbm %s771_s10, 8  ;;  %s776_s15 = scalar_lea.hbm %s1061_s6, 16 }
  0xc0   : > { %p773_p10 = scmp.ne.s32.totalorder %s771_s10, %s772_s20  ;;  %p777_p0 = scmp.lt.s32.totalorder %s771_s10, %s1061_s6 }
  0xc1   : > { %p778_p2 = scmp.lt.s32.totalorder %s776_s15, %s772_s20 }
  0xc2   : > { %p774_p13 = pnand %p773_p10, %p940_p4 }
  0xc3   : > { %p779_p1 = por %p778_p2, %p777_p0 }
  0xc4   : > { %p775_p11 = pneg %p774_p13 }
  0xc6   : > { %p780_p3 = pnand %p779_p1, %p775_p11 }
  0xc8   : > { %783 = shalt.err (!%p780_p3)
}
  0xc9   : > { %573 = dma.vmem_to_hbm [thread:$0]  (%p940_p4), %s415_s25, 128, %s1007_s13, %s388_s9  }
  0xca PF: > { %s428_s26 = sand.u32 1, %s818_s21   ;;  %p1070_p5 = scmp.ge.s32.totalorder %s830_s24, 2 }
  0xcb   : > { %s429_s12 = scalar_lea.sflag [#allocation4], %s428_s26 }
  0xcc   : > { %p588_p12 = pnand %p1070_p5, %p944_p6 }
  0xce   : > { %p589_p7 = pneg %p588_p12 }
  0xd0   : > { %809 = dma.done.wait (%p589_p7), %s429_s12, 128  }
  0xd1   : > { %811 = vsyncadd (%p589_p7), %s429_s12, 4294967168  ;;  %s439_s28 = scalar_lea.sflag [#allocation10], %s428_s26 }
  0xd2   : > { %813 = dma.done.wait (%p589_p7), %s439_s28, 128  }
  0xd3   : > { %815 = vsyncadd (%p589_p7), %s439_s28, 4294967168  ;;  %p24_p4 = scmp.ge.s32.totalorder %s914_s16, 4   ;;  %s1071_s21 = smov %s822_s22 }
  0xd4   : > { %s1072_s22 = smov %s826_s23  ;;  %s1073_s23 = smov %s925_s19 }
  0xd5   : > { %s1074_s24 = smov %s914_s16  ;;  %26 = sbr.rel (!%p24_p4) target bundleno = 10 (0xa), region = 110 }
  0xda   :  { %445 = vsyncpa [#allocation3], 1 }
  0xdb   :  { %447 = vsyncpa [#allocation3 + $0x1], 1 }
  0xdc   :  { %448 = vsyncpa [#allocation6], 1 }
  0xdd   :  { %449 = vsyncpa [#allocation4], 1 }
  0xde   :  { %451 = vsyncpa [#allocation4 + $0x1], 1 }
  0xdf   :  { %452 = vsyncpa [#allocation10], 1 }
  0xe0   :  { %454 = vsyncpa [#allocation10 + $0x1], 1 }

</bundles_post_ra>
